<compile_context>
chip_gen: v7x
topology: tpu7x:2x2x1
jax: 0.10.0
libtpu: 0.0.40
codegen_flags: <defaults>
</compile_context>

<pallas_src>
import functools

import jax
import jax.numpy as jnp
from jax.experimental import pallas as pl
from jax.experimental.pallas import tpu as pltpu

_LANE = 128
_MIB = 1024 * 1024


def _round_up(v, m):
    return ((v + m - 1) // m) * m


def _gated_attn_kernel(x_ref, wab_ref, bab_ref, wc_ref, bc_ref, out_ref, *,
                       d_pad, compute_dtype):
    """One row tile: A = (tanh(xWa+ba) * sigmoid(xWb+bb)) Wc + bc (padded)."""
    # Cast the row tile to the MXU compute dtype in VMEM (no extra HBM pass;
    # no-op when x already matches compute_dtype).
    x = x_ref[...].astype(compute_dtype)

    # Fused first stage: one MXU pass for both branches, f32 accumulation.
    y = jnp.dot(x, wab_ref[...], preferred_element_type=jnp.float32)
    y = y + bab_ref[...]                          # single VPU bias add on f32 acc

    a = jnp.tanh(y[:, :d_pad])                    # lane-aligned split (d_pad % 128 == 0)
    b = jax.nn.sigmoid(y[:, d_pad:])
    gated = (a * b).astype(wc_ref.dtype)          # padded cols: tanh(0)*sigmoid(0) == 0

    # Second stage on the MXU with a lane-dense (block_n, Cp) output tile.
    # TODO(synk): for n_classes == 1 and very large N, a transposed (8, N)
    # output layout would cut writeback 16x; kept simple here.
    A = jnp.dot(gated, wc_ref[...], preferred_element_type=jnp.float32)
    out_ref[...] = (A + bc_ref[...]).astype(out_ref.dtype)


def prepare_attn_net_gated_params(wa_t, ba, wb_t, bb, wc_t, bc, *,
                                  compute_dtype=jnp.bfloat16):
    """Fuse + zero-pad the three Linear layers once (constants at inference).

    Weights are pre-transposed to (in, out). Returns a dict consumed by
    attn_net_gated(); build it once and reuse across calls.
    """
    L, D = wa_t.shape
    C = wc_t.shape[1]
    Dp = _round_up(D, _LANE)
    Cp = _round_up(C, _LANE)

    wa_p = jnp.zeros((L, Dp), compute_dtype).at[:, :D].set(wa_t.astype(compute_dtype))
    wb_p = jnp.zeros((L, Dp), compute_dtype).at[:, :D].set(wb_t.astype(compute_dtype))
    wab = jnp.concatenate([wa_p, wb_p], axis=1)                 # (L, 2*Dp)
    bab = (jnp.zeros((1, 2 * Dp), jnp.float32)
           .at[0, :D].set(ba.astype(jnp.float32))
           .at[0, Dp:Dp + D].set(bb.astype(jnp.float32)))

    wc_p = jnp.zeros((Dp, Cp), compute_dtype).at[:D, :C].set(wc_t.astype(compute_dtype))
    bc_p = jnp.zeros((1, Cp), jnp.float32).at[0, :C].set(bc.astype(jnp.float32))

    return dict(wab=wab, bab=bab, wc=wc_p, bc=bc_p,
                L=L, D=D, C=C, Dp=Dp, Cp=Cp, compute_dtype=compute_dtype)


def attn_net_gated(x, params, *, block_n=512):
    """Pallas forward. x: (N, L). Returns (A, x) like the nn.Module forward."""
    N, L = x.shape
    assert L == params["L"]
    Dp, Cp, C = params["Dp"], params["Cp"], params["C"]
    compute_dtype = params["compute_dtype"]
    out_dtype = x.dtype

    x_item = jnp.dtype(x.dtype).itemsize
    w_item = jnp.dtype(compute_dtype).itemsize
    o_item = jnp.dtype(out_dtype).itemsize

    # Sub-32-bit dtypes pack 16 rows per vreg sublane group; round accordingly.
    multiple = 16 if min(x_item, w_item) < 4 else 8
    block_n = min(_round_up(block_n, multiple), _round_up(N, multiple))
    # v7x has 2 TensorCores sharding the "parallel" row axis: keep >= 2 grid
    # steps whenever the problem is big enough to split (no-op on v5e/v6e).
    if pl.cdiv(N, block_n) < 2 and N >= 2 * _LANE:
        block_n = _round_up(pl.cdiv(N, 2), multiple)

    grid = (pl.cdiv(N, block_n),)

    # VMEM budget: double-buffered x/out tiles + resident fused weights + f32
    # activation temporaries, with headroom. Floor 32 MiB (v5e scoped default is
    # 16 MiB); cap 56 MiB to stay inside v7x's 64 MiB physical VMEM per TC.
    est = (2 * block_n * L * x_item                 # x tiles (double buffer)
           + 2 * block_n * Cp * o_item              # out tiles
           + 2 * (L * 2 * Dp + Dp * Cp) * w_item    # weights (x2 safety)
           + 2 * (2 * Dp + Cp) * 4                  # biases (f32)
           + 4 * block_n * 2 * Dp * 4)              # f32 temporaries (y, a, b, gated)
    vmem_limit = int(min(max(32 * _MIB, 1.5 * est), 56 * _MIB))

    cost = pl.CostEstimate(
        flops=2 * N * L * (2 * Dp) + 2 * N * Dp * Cp,
        transcendentals=2 * N * Dp,
        bytes_accessed=(N * L * x_item + N * Cp * o_item
                        + (L * 2 * Dp + Dp * Cp) * w_item + (2 * Dp + Cp) * 4),
    )

    kernel = functools.partial(_gated_attn_kernel, d_pad=Dp,
                               compute_dtype=compute_dtype)

    # Ragged N: the boundary x tile may contain garbage rows past N, but each
    # output row depends only on its own input row and rows >= N are discarded
    # on writeback — do NOT "fix" this with a wrapper-side jnp.pad (it would
    # add a full extra HBM round trip of x).
    A_padded = pl.pallas_call(
        kernel,
        out_shape=jax.ShapeDtypeStruct((N, Cp), out_dtype),
        grid_spec=pltpu.PrefetchScalarGridSpec(
            num_scalar_prefetch=0,
            grid=grid,
            in_specs=[
                # If xprof ever shows exposed DMA on the x stream, add
                # pipeline_mode=pl.Buffered(3) to this (and only this) spec.
                pl.BlockSpec((block_n, L), lambda i: (i, 0)),    # x row tile
                pl.BlockSpec((L, 2 * Dp), lambda i: (0, 0)),     # fused Wa|Wb
                pl.BlockSpec((1, 2 * Dp), lambda i: (0, 0)),     # fused ba|bb (f32)
                pl.BlockSpec((Dp, Cp), lambda i: (0, 0)),        # Wc (padded)
                pl.BlockSpec((1, Cp), lambda i: (0, 0)),         # bc (padded, f32)
            ],
            out_specs=pl.BlockSpec((block_n, Cp), lambda i: (i, 0)),
        ),
        compiler_params=pltpu.CompilerParams(
            dimension_semantics=("parallel",),
            vmem_limit_bytes=vmem_limit,
        ),
        cost_estimate=cost,
    )(x, params["wab"], params["bab"], params["wc"], params["bc"])

    A = A_padded[:, :C]
    return A, x


def _init_linear(key, in_f, out_f, dtype=jnp.float32):
    """Deterministic PyTorch-style init: U(-1/sqrt(in_f), 1/sqrt(in_f))."""
    kw, kb = jax.random.split(key)
    bound = 1.0 / (in_f ** 0.5)
    # store transposed: (in_f, out_f) so the kernel does x @ W_t
    w_t = jax.random.uniform(kw, (in_f, out_f), dtype, -bound, bound)
    b = jax.random.uniform(kb, (out_f,), dtype, -bound, bound)
    return w_t, b


def _reference(x, wa_t, ba, wb_t, bb, wc_t, bc):
    a = jnp.tanh(x @ wa_t + ba)
    b = jax.nn.sigmoid(x @ wb_t + bb)
    return (a * b) @ wc_t + bc


if __name__ == "__main__":
    # TODO(synk): dropout (dropout=0 in the reference config) is omitted — inference path.
    key = jax.random.PRNGKey(0)
    n_classes = 1

    # --- Case 1: small demo shapes, f32 compute path, single grid step. -------
    N, L, D = 16, 32, 16
    kx, ka, kb, kc, key = jax.random.split(key, 5)
    x = jax.random.normal(kx, (N, L), jnp.float32)
    wa_t, ba = _init_linear(ka, L, D)           # attention_a Linear(L, D)
    wb_t, bb = _init_linear(kb, L, D)           # attention_b Linear(L, D)
    wc_t, bc = _init_linear(kc, D, n_classes)   # attention_c Linear(D, n_classes)

    params_f32 = prepare_attn_net_gated_params(
        wa_t, ba, wb_t, bb, wc_t, bc, compute_dtype=jnp.float32)
    A, x_out = attn_net_gated(x, params_f32)
    A = jax.block_until_ready(A)
    x_out = jax.block_until_ready(x_out)

    A_ref = _reference(x, wa_t, ba, wb_t, bb, wc_t, bc)
    assert A.shape == (N, n_classes)
    assert x_out.shape == (N, L)
    assert jnp.allclose(A, A_ref, atol=1e-4, rtol=1e-4)
    assert jnp.array_equal(x_out, x)

    # --- Case 2: ragged N, bf16 MXU path, multi-step grid (megacore split). ---
    N2, L2, D2 = 300, 64, 32
    kx2, ka2, kb2, kc2, key = jax.random.split(key, 5)
    x2 = jax.random.normal(kx2, (N2, L2), jnp.float32)
    wa2, ba2 = _init_linear(ka2, L2, D2)
    wb2, bb2 = _init_linear(kb2, L2, D2)
    wc2, bc2 = _init_linear(kc2, D2, n_classes)

    params_bf16 = prepare_attn_net_gated_params(
        wa2, ba2, wb2, bb2, wc2, bc2, compute_dtype=jnp.bfloat16)
    A2, x2_out = attn_net_gated(x2, params_bf16)   # default block_n=512 -> split
    A2 = jax.block_until_ready(A2)

    A2_ref = _reference(x2, wa2, ba2, wb2, bb2, wc2, bc2)
    assert A2.shape == (N2, n_classes)
    assert jnp.allclose(A2, A2_ref, atol=4e-2, rtol=4e-2)   # bf16 matmul tolerance
    assert jnp.array_equal(x2_out, x2)

    print("KERNEL_OK")
</pallas_src>

<mosaic_0001>
module attributes {stable_mosaic.version = 11 : i64} {
  func.func @_gated_attn_kernel(%arg0: i32, %arg1: memref<16x32xf32, #tpu.memory_space<vmem>>, %arg2: memref<32x256xf32, #tpu.memory_space<vmem>>, %arg3: memref<1x256xf32, #tpu.memory_space<vmem>>, %arg4: memref<128x128xf32, #tpu.memory_space<vmem>>, %arg5: memref<1x128xf32, #tpu.memory_space<vmem>>, %arg6: memref<16x128xf32, #tpu.memory_space<vmem>>) attributes {dimension_semantics = [#tpu.dimension_semantics<parallel>], iteration_bounds = array<i64: 1>, scalar_prefetch = 0 : i64, scratch_operands = 0 : i64, tpu.core_type = #tpu.core_type<tc>, window_params = [{transform_indices = @transform_0, window_bounds = array<i64: 16, 32>}, {pipeline_mode = #tpu.pipeline_mode<synchronous>, transform_indices = @transform_1, window_bounds = array<i64: 32, 256>}, {pipeline_mode = #tpu.pipeline_mode<synchronous>, transform_indices = @transform_2, window_bounds = array<i64: 1, 256>}, {pipeline_mode = #tpu.pipeline_mode<synchronous>, transform_indices = @transform_3, window_bounds = array<i64: 128, 128>}, {pipeline_mode = #tpu.pipeline_mode<synchronous>, transform_indices = @transform_4, window_bounds = array<i64: 1, 128>}, {transform_indices = @transform_5, window_bounds = array<i64: 16, 128>}]} {
    %c0 = arith.constant 0 : index
    %c0_0 = arith.constant 0 : index
    %0 = vector.load %arg1[%c0, %c0_0] : memref<16x32xf32, #tpu.memory_space<vmem>>, vector<16x32xf32>
    %c0_1 = arith.constant 0 : index
    %c0_2 = arith.constant 0 : index
    %1 = vector.load %arg2[%c0_1, %c0_2] : memref<32x256xf32, #tpu.memory_space<vmem>>, vector<32x256xf32>
    %cst = arith.constant dense<0.000000e+00> : vector<16x256xf32>
    %2 = tpu.matmul %0, %1, %cst {dimension_numbers = #tpu.dot_dimension_numbers<[1], [0], [0], [1], [0, 0, 1, 1], [], []>} : vector<16x32xf32>, vector<32x256xf32>, vector<16x256xf32> -> vector<16x256xf32>
    %c0_3 = arith.constant 0 : index
    %c0_4 = arith.constant 0 : index
    %3 = vector.load %arg3[%c0_3, %c0_4] : memref<1x256xf32, #tpu.memory_space<vmem>>, vector<1x256xf32>
    %4 = vector.broadcast %3 : vector<1x256xf32> to vector<16x256xf32>
    %5 = arith.addf %2, %4 : vector<16x256xf32>
    %6 = vector.extract_strided_slice %5 {offsets = [0, 0], sizes = [16, 128], strides = [1, 1]} : vector<16x256xf32> to vector<16x128xf32>
    %7 = math.tanh %6 : vector<16x128xf32>
    %8 = vector.extract_strided_slice %5 {offsets = [0, 128], sizes = [16, 128], strides = [1, 1]} : vector<16x256xf32> to vector<16x128xf32>
    %9 = arith.negf %8 : vector<16x128xf32>
    %10 = math.exp %9 : vector<16x128xf32>
    %cst_5 = arith.constant 1.000000e+00 : f32
    %11 = vector.broadcast %cst_5 : f32 to vector<16x128xf32>
    %12 = arith.addf %11, %10 : vector<16x128xf32>
    %13 = arith.divf %11, %12 : vector<16x128xf32>
    %14 = arith.mulf %7, %13 : vector<16x128xf32>
    %c0_6 = arith.constant 0 : index
    %c0_7 = arith.constant 0 : index
    %15 = vector.load %arg4[%c0_6, %c0_7] : memref<128x128xf32, #tpu.memory_space<vmem>>, vector<128x128xf32>
    %cst_8 = arith.constant dense<0.000000e+00> : vector<16x128xf32>
    %16 = tpu.matmul %14, %15, %cst_8 {dimension_numbers = #tpu.dot_dimension_numbers<[1], [0], [0], [1], [0, 0, 1, 1], [], []>} : vector<16x128xf32>, vector<128x128xf32>, vector<16x128xf32> -> vector<16x128xf32>
    %c0_9 = arith.constant 0 : index
    %c0_10 = arith.constant 0 : index
    %17 = vector.load %arg5[%c0_9, %c0_10] : memref<1x128xf32, #tpu.memory_space<vmem>>, vector<1x128xf32>
    %18 = vector.broadcast %17 : vector<1x128xf32> to vector<16x128xf32>
    %19 = arith.addf %16, %18 : vector<16x128xf32>
    %c0_11 = arith.constant 0 : index
    %c0_12 = arith.constant 0 : index
    %20 = vector.load %arg6[%c0_11, %c0_12] : memref<16x128xf32, #tpu.memory_space<vmem>>, vector<16x128xf32>
    tpu.vector_store %arg6[%c0_11, %c0_12], %19 {strides = array<i32>} : memref<16x128xf32, #tpu.memory_space<vmem>>, vector<16x128xf32>,
    return
  }
  func.func @transform_0(%arg0: i32) -> (i32, i32) {
    %c0_i32 = arith.constant 0 : i32
    %c0_i32_0 = arith.constant 0 : i32
    return %arg0, %c0_i32 : i32, i32
  }
  func.func @transform_1(%arg0: i32) -> (i32, i32) {
    %c0_i32 = arith.constant 0 : i32
    %c0_i32_0 = arith.constant 0 : i32
    %c0_i32_1 = arith.constant 0 : i32
    return %c0_i32, %c0_i32_0 : i32, i32
  }
  func.func @transform_2(%arg0: i32) -> (i32, i32) {
    %c0_i32 = arith.constant 0 : i32
    %c0_i32_0 = arith.constant 0 : i32
    %c0_i32_1 = arith.constant 0 : i32
    return %c0_i32, %c0_i32_0 : i32, i32
  }
  func.func @transform_3(%arg0: i32) -> (i32, i32) {
    %c0_i32 = arith.constant 0 : i32
    %c0_i32_0 = arith.constant 0 : i32
    %c0_i32_1 = arith.constant 0 : i32
    return %c0_i32, %c0_i32_0 : i32, i32
  }
  func.func @transform_4(%arg0: i32) -> (i32, i32) {
    %c0_i32 = arith.constant 0 : i32
    %c0_i32_0 = arith.constant 0 : i32
    %c0_i32_1 = arith.constant 0 : i32
    return %c0_i32, %c0_i32_0 : i32, i32
  }
  func.func @transform_5(%arg0: i32) -> (i32, i32) {
    %c0_i32 = arith.constant 0 : i32
    %c0_i32_0 = arith.constant 0 : i32
    return %arg0, %c0_i32 : i32, i32
  }
}

</mosaic_0001>

<bundles_post_ra>
// kernel: tpu_custom_call.1
= control target key start
LH: loop header
LB: loop body
LE: loop exit
PB: predicated region body
PF: predicated region fallthrough
CT: control target
= control target key end

     0   :  { %10 = vsyncpa [#allocation3], 0  ;;  %s617_s0 = inlined_call_operand.hbm [shape: f32[16,32], index: 0, kind: input, shape index: {}]   ;;  %s618_s1 = inlined_call_operand.hbm [shape: f32[32,256], index: 1, kind: input, shape index: {}]   ;;  %s619_s2 = inlined_call_operand.vmem [shape: f32[1,256], index: 2, kind: input, shape index: {}]   ;;  %s620_s3 = inlined_call_operand.hbm [shape: f32[128,128], index: 3, kind: input, shape index: {}]   ;;  %s621_s4 = inlined_call_operand.vmem [shape: f32[1,128], index: 4, kind: input, shape index: {}]   ;;  %s622_s5 = inlined_call_operand.hbm [shape: f32[16,128], index: 5, kind: output, shape index: {}]  }
   0x1   :  { %11 = vsyncpa [#allocation6], 0 }
   0x2   :  { %12 = vsyncpa [#allocation4], 0  ;;  %s515_s18 = smov [#allocation5]   ;;  %s421_s22 = scalar_lea.hbm %s618_s1, 1024 }
   0x3   :  { %s30_s19 = sshll.u32 %s515_s18, 4  ;;  %p422_p0 = scmp.ne.s32.totalorder %s618_s1, %s421_s22  ;;  %s31_s19 = int_to_ptr.vmem [resolvable:$true] %s30_s19 }
   0x4   :  { %p425_p1 = scmp.lt.u32.totalorder %s421_s22, %s618_s1 }
   0x6   :  { %p427_p2 = pnand %p425_p1, %p422_p0 }
   0x8   :  { %430 = shalt.err (!%p427_p2)
}
   0x9   :  { %s431_s27 = scalar_lea.vmem %s31_s19, 1024  ;;  %p436_p4 = scmp.lt.s32.totalorder %s31_s19, %s31_s19 }
   0xa   :  { %p432_p3 = scmp.ne.s32.totalorder %s31_s19, %s431_s27  ;;  %p437_p5 = scmp.lt.s32.totalorder %s431_s27, %s431_s27 }
   0xc   :  { %p438_p6 = por %p437_p5, %p436_p4 }
   0xe   :  { %p439_p7 = pnand %p438_p6, %p432_p3 }
  0x10   :  { %442 = shalt.err (!%p439_p7)
}
  0x11   :  { %s516_s28 = smov 256   ;;  %s517_s29 = smov 16  }
  0x12   :  { %36 = dma.hbm_to_vmem [thread:$0]  %s618_s1, 1024, %s31_s19, [#allocation6], %s516_s28, %s516_s28, %s517_s29  }
  0x13   :  { %s518_s7 = smov [#allocation2]   ;;  %s443_s11 = scalar_lea.hbm %s617_s0, 256 }
  0x14   :  { %s18_s8 = sshll.u32 %s518_s7, 4  ;;  %p444_p8 = scmp.ne.s32.totalorder %s617_s0, %s443_s11  ;;  %s19_s8 = int_to_ptr.vmem [resolvable:$true] %s18_s8 }
  0x15   :  { %p447_p9 = scmp.lt.u32.totalorder %s443_s11, %s617_s0 }
  0x17   :  { %p449_p10 = pnand %p447_p9, %p444_p8 }
  0x19   :  { %452 = shalt.err (!%p449_p10)
}
  0x1a   :  { %s453_s16 = scalar_lea.vmem %s19_s8, 256  ;;  %p458_p12 = scmp.lt.s32.totalorder %s19_s8, %s19_s8 }
  0x1b   :  { %p454_p11 = scmp.ne.s32.totalorder %s19_s8, %s453_s16  ;;  %p459_p13 = scmp.lt.s32.totalorder %s453_s16, %s453_s16 }
  0x1d   :  { %p460_p0 = por %p459_p13, %p458_p12 }
  0x1f   :  { %p461_p1 = pnand %p460_p0, %p454_p11 }
  0x21   :  { %464 = shalt.err (!%p461_p1)
}
  0x22   :  { %s519_s1 = smov 128   ;;  %s520_s17 = smov 8  }
  0x23   :  { %24 = dma.hbm_to_vmem [thread:$0]  %s617_s0, 256, %s19_s8, [#allocation3], %s519_s1, %s519_s1, %s520_s17  }
  0x24   :  { %s521_s20 = smov [#allocation7]   ;;  %s465_s24 = scalar_lea.hbm %s620_s3, 2048 }
  0x25   :  { %s44_s21 = sshll.u32 %s521_s20, 4  ;;  %p466_p2 = scmp.ne.s32.totalorder %s620_s3, %s465_s24  ;;  %s45_s21 = int_to_ptr.vmem [resolvable:$true] %s44_s21 }
  0x26   :  { %p469_p3 = scmp.lt.u32.totalorder %s465_s24, %s620_s3 }
  0x28   :  { %p471_p4 = pnand %p469_p3, %p466_p2 }
  0x2a   :  { %474 = shalt.err (!%p471_p4)
}
  0x2b   :  { %s475_s29 = scalar_lea.vmem %s45_s21, 2048  ;;  %p480_p6 = scmp.lt.s32.totalorder %s45_s21, %s45_s21 }
  0x2c   :  { %p476_p5 = scmp.ne.s32.totalorder %s45_s21, %s475_s29  ;;  %p481_p7 = scmp.lt.s32.totalorder %s475_s29, %s475_s29 }
  0x2e   :  { %p482_p8 = por %p481_p7, %p480_p6 }
  0x30   :  { %p483_p9 = pnand %p482_p8, %p476_p5 }
  0x32   :  { %486 = shalt.err (!%p483_p9)
}
  0x33   :  { %50 = dma.hbm_to_vmem [thread:$0]  %s620_s3, 2048, %s45_s21, [#allocation6], %s519_s1, %s519_s1, %s520_s17  }
  0x34   :  { %509 = dma.done.wait [#allocation3], 256  }
  0x35   :  { %510 = vsyncadd [#allocation3], 4294967040 }
  0x36   :  { %511 = dma.done.wait [#allocation6], 3072  }
  0x37   :  { %512 = vsyncadd [#allocation6], 4294964224  ;;  %v522_v0 = vmov 0.0   ;;  %v65_v1 = vld [vmem:[#allocation5 + $0x8] sm:$0xff]  ;;  %v67_v2 = vld [vmem:[#allocation5 + $0x18] sm:$0xff]  ;;  %vm84_vm0 = vcmask 261120   ;;  %v74_v39 = vlaneseq }
  0x38   :  { %155 = vmatprep.mubr.f32.mxu0 %v522_v0  ;;  %v64_v3 = vld [vmem:[#allocation5] sm:$0xff]  ;;  %v360_v4 = vpack.c.bf16 %v67_v2, %v65_v1  ;;  %v66_v5 = vld [vmem:[#allocation5 + $0x10] sm:$0xff]  ;;  %v69_v6 = vld [vmem:[#allocation5 + $0x28] sm:$0xff]  ;;  %s523_s8 = smov [#allocation8]  }
  0x39   :  { %v71_v7 = vld [vmem:[#allocation5 + $0x38] sm:$0xff]  ;;  %v362_v8 = vpack.c.bf16 %v66_v5, %v64_v3  ;;  %v68_v10 = vld [vmem:[#allocation5 + $0x20] sm:$0xff]  ;;  %v70_v11 = vld [vmem:[#allocation5 + $0x30] sm:$0xff]  ;;  %v75_v40 = vshrl.u32 %v74_v39, 7  ;;  %s289_s9 = sshll.u32 %s523_s8, 4  ;;  %s290_s9 = int_to_ptr.vmem [resolvable:$true] %s289_s9 }
  0x3a   :  { %v364_v9 = vpack.c.bf16 %v71_v7, %v69_v6  ;;  %361 = vmatprep.subr.bf16.mxu0 %v360_v4  ;;  %v366_v12 = vpack.c.bf16 %v70_v11, %v68_v10  ;;  %v62_v13 = vld [vmem:[#allocation2] sm:$0xff]  ;;  %v63_v14 = vld [vmem:[#allocation2 + $0x8] sm:$0xff]  ;;  %v184_v15 = vld [vmem:[#allocation7] sm:$0xff]  ;;  %s487_s10 = scalar_lea.vmem %s290_s9, 256  ;;  %p492_p11 = scmp.lt.s32.totalorder %s290_s9, %s290_s9 }
  0x3b   :  { %363 = vmatpush1.bf16.msra.mxu0 %v362_v8  ;;  %v185_v16 = vld [vmem:[#allocation7 + $0x8] sm:$0xff]  ;;  %v186_v18 = vld [vmem:[#allocation7 + $0x10] sm:$0xff]  ;;  %v187_v19 = vld [vmem:[#allocation7 + $0x18] sm:$0xff]  ;;  %v80_v41 = vsub.s32 1, %v75_v40  ;;  %v76_v50 = vsub.s32 0, %v75_v40  ;;  %p488_p10 = scmp.ne.s32.totalorder %s290_s9, %s487_s10  ;;  %p493_p12 = scmp.lt.s32.totalorder %s487_s10, %s487_s10 }
  0x3c   :  { %365 = vmatprep.subr.bf16.mxu0 %v364_v9  ;;  %v368_v17 = vpack.c.bf16 %v185_v16, %v184_v15  ;;  %v372_v20 = vpack.c.bf16 %v187_v19, %v186_v18  ;;  %v188_v21 = vld [vmem:[#allocation7 + $0x20] sm:$0xff]  ;;  %v189_v22 = vld [vmem:[#allocation7 + $0x28] sm:$0xff]  ;;  %v190_v24 = vld [vmem:[#allocation7 + $0x30] sm:$0xff] }
  0x3d   :  { %v376_v23 = vpack.c.bf16 %v189_v22, %v188_v21  ;;  %v191_v25 = vld [vmem:[#allocation7 + $0x38] sm:$0xff]  ;;  %v192_v27 = vld [vmem:[#allocation7 + $0x40] sm:$0xff]  ;;  %v193_v28 = vld [vmem:[#allocation7 + $0x48] sm:$0xff]  ;;  %p494_p13 = por %p493_p12, %p492_p11 }
  0x3e   :  { %369 = vmatprep.subr.bf16.mxu1 %v368_v17  ;;  %v380_v26 = vpack.c.bf16 %v191_v25, %v190_v24  ;;  %v384_v29 = vpack.c.bf16 %v193_v28, %v192_v27  ;;  %v194_v30 = vld [vmem:[#allocation7 + $0x50] sm:$0xff]  ;;  %v195_v31 = vld [vmem:[#allocation7 + $0x58] sm:$0xff]  ;;  %v196_v33 = vld [vmem:[#allocation7 + $0x60] sm:$0xff] }
  0x3f   :  { %367 = vmatpush1.bf16.msra.mxu0 %v366_v12  ;;  %371 = vmatpush3.bf16.msra.mxu1 %v368_v17  ;;  %v388_v32 = vpack.c.bf16 %v195_v31, %v194_v30  ;;  %v197_v34 = vld [vmem:[#allocation7 + $0x68] sm:$0xff]  ;;  %v198_v35 = vld [vmem:[#allocation7 + $0x70] sm:$0xff]  ;;  %v199_v37 = vld [vmem:[#allocation7 + $0x78] sm:$0xff]  ;;  %p495_p0 = pnand %p494_p13, %p488_p10 }
  0x40   :  { %373 = vmatprep.subr.bf16.mxu1 %v372_v20  ;;  %v392_v36 = vpack.c.bf16 %v197_v34, %v196_v33  ;;  %v396_v38 = vpack.c.bf16 %v199_v37, %v198_v35  ;;  %v72_v42 = vld [vmem:[%s619_s2] sm:$0x3] }
  0x41   :  { %v81_v43 = vrot.slane %v72_v42, %v80_v41  ;;  %v77_v53 = vrot.slane %v72_v42, %v76_v50  ;;  %v306_v2 = vld [vmem:[%s621_s4] ss:$0 sm:$0xff] }
  0x42   :  { %302 = vmatmul.mubr.msk.f32.vlgmr.msra.gmra.mrb[0].mxu0 %vm84_vm0, %v62_v13 }
  0x43   :  { %161 = vmatprep.mubr.f32.mxu0 %v522_v0  ;;  %375 = vmatpush3.bf16.msra.mxu1 %v372_v20 }
  0x44   :  { %377 = vmatprep.subr.bf16.mxu1 %v376_v23 }
  0x46   :  { %303 = vmatmul.mubr.msk.f32.gmra.mrb[2].mxu0 %vm84_vm0, %v63_v14 }
  0x47   :  { %379 = vmatpush3.bf16.msra.mxu1 %v376_v23 }
  0x48   :  { %381 = vmatprep.subr.bf16.mxu1 %v380_v26 }
  0x4b   :  { %383 = vmatpush3.bf16.msra.mxu1 %v380_v26 }
  0x4c   :  { %385 = vmatprep.subr.bf16.mxu1 %v384_v29 }
  0x4f   :  { %387 = vmatpush3.bf16.msra.mxu1 %v384_v29 }
  0x50   :  { %389 = vmatprep.subr.bf16.mxu1 %v388_v32 }
  0x53   :  { %391 = vmatpush3.bf16.msra.mxu1 %v388_v32 }
  0x54   :  { %393 = vmatprep.subr.bf16.mxu1 %v392_v36 }
  0x57   :  { %395 = vmatpush3.bf16.msra.mxu1 %v392_v36 }
  0x58   :  { %397 = vmatprep.subr.bf16.mxu1 %v396_v38 }
  0x5b   :  { %399 = vmatpush3.bf16.msra.mxu1 %v396_v38 }
 0x115   :  { %v157_v44 = vpop.f32.mrb[0].mxu0 }
 0x116   :  { %v159_v45 = vpop.f32.mrb[1].mxu0  ;;  %v158_v54 = vadd.f32 %v157_v44, %v77_v53 }
 0x117   :  { %v160_v46 = vadd.f32 %v159_v45, %v81_v43 }
 0x119   :  { %v304_v47 = vmul.f32 -1.442695, %v160_v46  ;;  %v163_v48 = vpop.f32.mrb[2].mxu0 }
 0x11a   :  { %v165_v49 = vpop.f32.mrb[3].mxu0  ;;  %v164_v57 = vadd.f32 %v163_v48, %v77_v53 }
 0x11b   :  { %409 = vpow2.f32 %v304_v47  ;;  %v166_v51 = vadd.f32 %v165_v49, %v81_v43 }
 0x11d   :  { %v305_v52 = vmul.f32 -1.442695, %v166_v51 }
 0x11f   :  { %411 = vpow2.f32 %v305_v52 }
 0x120   :  { %413 = vtanh.f32 %v158_v54 }
 0x125   :  { %v410_v55 = vpop.eup %409 }
 0x126   :  { %v176_v56 = vadd.f32 1.0, %v410_v55 }
 0x128   :  { %415 = vrcp.f32 %v176_v56 }
 0x129   :  { %v412_v58 = vpop.eup %411  ;;  %417 = vtanh.f32 %v164_v57 }
 0x12a   :  { %v177_v59 = vadd.f32 1.0, %v412_v58  ;;  %v414_v60 = vpop.eup %413 }
 0x12c   :  { %419 = vrcp.f32 %v177_v59 }
 0x132   :  { %v416_v61 = vpop.eup %415 }
 0x133   :  { %v182_v62 = vmul.f32 %v416_v61, %v414_v60  ;;  %v418_v63 = vpop.eup %417 }
 0x135   :  { %357 = vmatprep.mubr.f32.mxu1 %v182_v62 }
 0x136   :  { %v420_v0 = vpop.eup %419 }
 0x137   :  { %v183_v1 = vmul.f32 %v420_v0, %v418_v63 }
 0x139   :  { %358 = vmatmul.mubr.f32.vlgmr.msra.gmra.mrb[0].mxu1 %v183_v1 }
 0x20c   :  { %v359_v3 = vpop.f32.mrb[0].mxu1 }
 0x20d   :  { %v279_v4 = vadd.f32 %v359_v3, %v306_v2  ;;  %v273_v5 = vpop.f32.mrb[1].mxu1 }
 0x20e   :  { %v274_v6 = vadd.f32 %v306_v2, %v273_v5 }
 0x20f   :  { %283 = vst [vmem:[#allocation8 + $0x8] sm:$0xff] %v279_v4 }
 0x210   :  { %282 = vst [vmem:[#allocation8] sm:$0xff] %v274_v6 }
 0x211   :  { %498 = shalt.err (!%p495_p0)
}
 0x212   :  { %s499_s4 = scalar_lea.hbm %s622_s5, 256 }
 0x213   :  { %p500_p1 = scmp.ne.s32.totalorder %s622_s5, %s499_s4  ;;  %p503_p2 = scmp.lt.u32.totalorder %s499_s4, %s622_s5 }
 0x215   :  { %p505_p3 = pnand %p503_p2, %p500_p1 }
 0x217   :  { %508 = shalt.err (!%p505_p3)
}
 0x218   :  { %295 = dma.vmem_to_hbm [thread:$0]  %s290_s9, 256, %s622_s5, [#allocation4], %s519_s1, %s519_s1, %s520_s17  }
 0x219   :  { %513 = dma.done.wait [#allocation4], 256  }
 0x21a   :  { %514 = vsyncadd [#allocation4], 4294967040 }
 0x21b   :  { %299 = vsyncpa [#allocation3], 1 }
 0x21c   :  { %300 = vsyncpa [#allocation6], 1 }
 0x21d   :  { %301 = vsyncpa [#allocation4], 1 }

</bundles_post_ra>
